<compile_context>
chip_gen: v7x
topology: tpu7x:2x2x1
jax: 0.10.0
libtpu: 0.0.40
codegen_flags: <defaults>
</compile_context>

<pallas_src>
import functools
import math

import jax
import jax.numpy as jnp
from jax import lax
from jax.experimental import pallas as pl
from jax.experimental.pallas import tpu as pltpu

BN_EPS = 1e-5
NEG_SLOPE = 0.1
LANE = 128


def _leaky(v):
    # LeakyReLU(0 < slope < 1): max(v, slope*v) == where(v>=0, v, slope*v).
    return jnp.maximum(v, NEG_SLOPE * v)


def _encoder_kernel(block_meta, x_ref, a_ref, *rest):
    """block_meta: tuple of (is_projection_shortcut, d_out) per block.

    rest = [w_ref, b_ref] per block, then out_ref.
    w_ref: (d_in, 2*d_out) = [W_folded | Wsc] for projection blocks,
           (d_in, d_out)   = W_folded          for identity blocks.
    b_ref: (2, d_out) = [fused conv+BN bias; shortcut bias]  (projection)
           (1, d_out) = [fused conv+BN bias]                 (identity)
    """
    out_ref = rest[-1]
    param_refs = rest[:-1]

    x = x_ref[...]                      # (N, d0) f32, lane-padded
    a = a_ref[...]                      # (N, N) bf16 normalized adjacency

    idx = 0
    for is_proj, d_out in block_meta:   # trace-time unroll over blocks
        w = param_refs[idx][...]
        b = param_refs[idx + 1][...]
        idx += 2

        # Single MXU matmul: x @ [W'|Wsc] (or x @ W' for identity blocks).
        xw = jnp.dot(x, w, preferred_element_type=jnp.float32)
        if is_proj:
            conv_part = xw[:, :d_out]                 # static 128-aligned split
            res = xw[:, d_out:] + b[1:2, :]           # shortcut projection
        else:
            conv_part = xw
            res = x                                   # nn.Identity shortcut

        # GCN aggregation: A_norm @ (x @ W') + fused bias.  bf16 operands,
        # f32 accumulation (dominant O(N^2 d) term).
        h = jnp.dot(a, conv_part.astype(jnp.bfloat16),
                    preferred_element_type=jnp.float32) + b[0:1, :]

        h = _leaky(h)                   # BN already folded into W'/bias
        # Dropout: identity in inference mode.
        y = h + res
        x = _leaky(y)

    # F.normalize(x, p=2, dim=1): one rsqrt; sum-sq clamp 1e-24 ~= max(||x||,1e-12).
    sumsq = jnp.sum(x * x, axis=1, keepdims=True)
    out_ref[...] = (x * lax.rsqrt(jnp.maximum(sumsq, 1e-24))).astype(out_ref.dtype)


def _nbytes(arr):
    return int(arr.size) * int(arr.dtype.itemsize)


def gcn_encoder(x, a_norm, packed):
    """x: (N, d0) f32 (lane-padded), a_norm: (N, N), packed: fold_params output."""
    n = x.shape[0]
    d_last = packed[-1]["b"].shape[1]
    block_meta = tuple((p["proj"], p["b"].shape[1]) for p in packed)

    a_bf16 = a_norm.astype(jnp.bfloat16)       # halve the O(N^2) operand bytes
    inputs = [x, a_bf16]
    for p in packed:
        inputs.extend([p["w"], p["b"]])

    # Advisory cost estimate for XLA scheduling around the custom call.
    flops = 0
    for p in packed:
        d_in, cols = p["w"].shape
        d_out = p["b"].shape[1]
        flops += 2 * n * d_in * cols            # x @ [W'|Wsc]
        flops += 2 * n * n * d_out              # A_norm @ H
    out_bytes = n * d_last * 4
    bytes_accessed = sum(_nbytes(t) for t in inputs) + out_bytes

    # Explicit VMEM budget: grid-less call -> single-buffered, fully resident.
    # Size to residency with headroom; keep <= 64 MiB (v7x physical VMEM).
    vmem_limit = int(min(64 * 1024 * 1024,
                         max(32 * 1024 * 1024, 4 * (bytes_accessed + out_bytes))))

    kernel = functools.partial(_encoder_kernel, block_meta)
    return pl.pallas_call(
        kernel,
        out_shape=jax.ShapeDtypeStruct((n, d_last), jnp.float32),
        in_specs=[pl.BlockSpec(memory_space=pltpu.MemorySpace.VMEM)
                  for _ in inputs],
        out_specs=pl.BlockSpec(memory_space=pltpu.MemorySpace.VMEM),
        compiler_params=pltpu.CompilerParams(vmem_limit_bytes=vmem_limit),
        cost_estimate=pl.CostEstimate(flops=int(flops),
                                      transcendentals=int(n),
                                      bytes_accessed=int(bytes_accessed)),
    )(*inputs)


# ----------------------------------------------------------------------------
# Host-side (pure JAX) helpers: adjacency, params, BN folding, reference.
# ----------------------------------------------------------------------------
def build_norm_adj(edge_index, num_nodes):
    """add_self_loops + degree + D^-1/2 (A+I) D^-1/2, as in ResidualBlock."""
    row, col = edge_index[0], edge_index[1]
    loop = jnp.arange(num_nodes, dtype=row.dtype)
    row = jnp.concatenate([row, loop])
    col = jnp.concatenate([col, loop])
    a = jnp.zeros((num_nodes, num_nodes), jnp.float32).at[row, col].add(1.0)
    deg = jnp.sum(a, axis=1)                       # degree of edge_index[0]
    deg_inv_sqrt = jnp.where(deg > 0, lax.rsqrt(deg), 0.0)
    return deg_inv_sqrt[:, None] * a * deg_inv_sqrt[None, :]


def init_raw_params(key, dims):
    """Un-fused parameters, matching ResidualBlock.reset_parameters."""
    params = []
    for i in range(len(dims) - 1):
        d_in, d_out = dims[i], dims[i + 1]
        key, k1, k2, k3, k4 = jax.random.split(key, 5)
        gain = math.sqrt(2.0 / (1.0 + NEG_SLOPE ** 2))
        bound = gain * math.sqrt(6.0 / (d_in + d_out))
        w = jax.random.uniform(k1, (d_in, d_out), jnp.float32, -bound, bound)
        if d_in != d_out:                          # nn.Linear shortcut
            bsc = math.sqrt(6.0 / (d_in + d_out))
            wsc = jax.random.uniform(k2, (d_in, d_out), jnp.float32, -bsc, bsc)
            sc_b = jnp.zeros((d_out,), jnp.float32)
        else:                                      # nn.Identity shortcut
            wsc, sc_b = None, None
        params.append({
            "w": w,
            "conv_b": jnp.zeros((d_out,), jnp.float32),
            "gamma": jnp.ones((d_out,), jnp.float32),
            "beta": jnp.zeros((d_out,), jnp.float32),
            "mean": 0.1 * jax.random.normal(k3, (d_out,), jnp.float32),
            "var": 1.0 + 0.1 * jax.random.uniform(k4, (d_out,), jnp.float32),
            "wsc": wsc,
            "sc_b": sc_b,
        })
    return params


def fold_params(raw_params):
    """Fold BN into conv weight/bias; concat [W'|Wsc] for projection blocks."""
    packed = []
    for prm in raw_params:
        scale = prm["gamma"] * lax.rsqrt(prm["var"] + BN_EPS)
        w_f = prm["w"] * scale[None, :]
        b_f = (prm["conv_b"] - prm["mean"]) * scale + prm["beta"]
        if prm["wsc"] is not None:
            w = jnp.concatenate([w_f, prm["wsc"]], axis=1)    # (d_in, 2*d_out)
            b = jnp.stack([b_f, prm["sc_b"]], axis=0)         # (2, d_out)
            packed.append({"proj": True, "w": w, "b": b})
        else:
            packed.append({"proj": False, "w": w_f, "b": b_f[None, :]})
    return packed


def pad_input_features(x, packed, multiple=LANE):
    """Zero-pad the input feature dim (and first block's W rows) to lane width."""
    d_in = x.shape[1]
    pad = (-d_in) % multiple
    if pad == 0:
        return x, packed
    x = jnp.pad(x, ((0, 0), (0, pad)))
    first = dict(packed[0])
    first["w"] = jnp.pad(first["w"], ((0, pad), (0, 0)))
    return x, [first] + packed[1:]


def encoder_reference(x, a_norm, raw_params):
    """Pure-JAX f32 reference with the original (un-fused) module semantics."""
    hi = lax.Precision.HIGHEST
    for prm in raw_params:
        h = jnp.dot(x, prm["w"], precision=hi)
        h = jnp.dot(a_norm, h, precision=hi) + prm["conv_b"]
        h = (h - prm["mean"]) / jnp.sqrt(prm["var"] + BN_EPS) * prm["gamma"] + prm["beta"]
        h = jnp.where(h >= 0, h, NEG_SLOPE * h)
        if prm["wsc"] is not None:
            res = jnp.dot(x, prm["wsc"], precision=hi) + prm["sc_b"]
        else:
            res = x
        y = h + res
        x = jnp.where(y >= 0, y, NEG_SLOPE * y)
    norm = jnp.sqrt(jnp.sum(x * x, axis=1, keepdims=True))
    return x / jnp.maximum(norm, 1e-12)


if __name__ == "__main__":
    key = jax.random.PRNGKey(0)
    num_nodes = 64
    num_features = 32
    # block 0: 32 -> 128 (projection shortcut -> fused [W'|Wsc] matmul)
    # block 1: 128 -> 128 (nn.Identity shortcut -> no shortcut matmul at all)
    hidden_dims = [128, 128]

    key, kx, kp = jax.random.split(key, 3)
    x = jax.random.normal(kx, (num_nodes, num_features), dtype=jnp.float32)

    # Deterministic undirected ring graph: edges (i, i+1) in both directions.
    src = jnp.arange(num_nodes, dtype=jnp.int32)
    dst = (src + 1) % num_nodes
    edge_index = jnp.stack(
        [jnp.concatenate([src, dst]), jnp.concatenate([dst, src])], axis=0)

    a_norm = build_norm_adj(edge_index, num_nodes)
    raw_params = init_raw_params(kp, [num_features] + hidden_dims)

    packed = fold_params(raw_params)
    x_pad, packed = pad_input_features(x, packed)

    out = gcn_encoder(x_pad, a_norm, packed)
    out = jax.block_until_ready(out)

    ref = encoder_reference(x, a_norm, raw_params)
    assert out.shape == (num_nodes, hidden_dims[-1])
    # bf16 operands on the A@H matmul (deliberate, per perf guidance) with f32
    # accumulation: tolerance relaxed vs a pure-f32 HIGHEST-precision reference.
    assert jnp.allclose(out, ref, atol=1e-2, rtol=1e-2), "mismatch vs reference"

    print("KERNEL_OK")
</pallas_src>

<mosaic_0001>
module attributes {stable_mosaic.version = 11 : i64} {
  func.func @_encoder_kernel(%arg0: memref<64x128xf32, #tpu.memory_space<vmem>>, %arg1: memref<64x64xbf16, #tpu.memory_space<vmem>>, %arg2: memref<128x256xf32, #tpu.memory_space<vmem>>, %arg3: memref<2x128xf32, #tpu.memory_space<vmem>>, %arg4: memref<128x128xf32, #tpu.memory_space<vmem>>, %arg5: memref<1x128xf32, #tpu.memory_space<vmem>>, %arg6: memref<64x128xf32, #tpu.memory_space<vmem>>) attributes {dimension_semantics = [], scalar_prefetch = 0 : i64, scratch_operands = 0 : i64, tpu.core_type = #tpu.core_type<tc>} {
    %c0 = arith.constant 0 : index
    %c0_0 = arith.constant 0 : index
    %0 = vector.load %arg0[%c0, %c0_0] : memref<64x128xf32, #tpu.memory_space<vmem>>, vector<64x128xf32>
    %c0_1 = arith.constant 0 : index
    %c0_2 = arith.constant 0 : index
    %1 = vector.load %arg1[%c0_1, %c0_2] : memref<64x64xbf16, #tpu.memory_space<vmem>>, vector<64x64xbf16>
    %c0_3 = arith.constant 0 : index
    %c0_4 = arith.constant 0 : index
    %2 = vector.load %arg2[%c0_3, %c0_4] : memref<128x256xf32, #tpu.memory_space<vmem>>, vector<128x256xf32>
    %c0_5 = arith.constant 0 : index
    %c0_6 = arith.constant 0 : index
    %3 = vector.load %arg3[%c0_5, %c0_6] : memref<2x128xf32, #tpu.memory_space<vmem>>, vector<2x128xf32>
    %cst = arith.constant dense<0.000000e+00> : vector<64x256xf32>
    %4 = tpu.matmul %0, %2, %cst {dimension_numbers = #tpu.dot_dimension_numbers<[1], [0], [0], [1], [0, 0, 1, 1], [], []>} : vector<64x128xf32>, vector<128x256xf32>, vector<64x256xf32> -> vector<64x256xf32>
    %5 = vector.extract_strided_slice %4 {offsets = [0, 0], sizes = [64, 128], strides = [1, 1]} : vector<64x256xf32> to vector<64x128xf32>
    %6 = vector.extract_strided_slice %4 {offsets = [0, 128], sizes = [64, 128], strides = [1, 1]} : vector<64x256xf32> to vector<64x128xf32>
    %7 = vector.extract_strided_slice %3 {offsets = [1, 0], sizes = [1, 128], strides = [1, 1]} : vector<2x128xf32> to vector<1x128xf32>
    %8 = vector.broadcast %7 : vector<1x128xf32> to vector<64x128xf32>
    %9 = arith.addf %6, %8 : vector<64x128xf32>
    %10 = arith.truncf %5 : vector<64x128xf32> to vector<64x128xbf16>
    %cst_7 = arith.constant dense<0.000000e+00> : vector<64x128xf32>
    %11 = tpu.matmul %1, %10, %cst_7 {dimension_numbers = #tpu.dot_dimension_numbers<[1], [0], [0], [1], [0, 0, 1, 1], [], []>} : vector<64x64xbf16>, vector<64x128xbf16>, vector<64x128xf32> -> vector<64x128xf32>
    %12 = vector.extract_strided_slice %3 {offsets = [0, 0], sizes = [1, 128], strides = [1, 1]} : vector<2x128xf32> to vector<1x128xf32>
    %13 = vector.broadcast %12 : vector<1x128xf32> to vector<64x128xf32>
    %14 = arith.addf %11, %13 : vector<64x128xf32>
    %cst_8 = arith.constant 1.000000e-01 : f32
    %15 = vector.broadcast %cst_8 : f32 to vector<64x128xf32>
    %16 = arith.mulf %15, %14 : vector<64x128xf32>
    %17 = arith.maximumf %14, %16 : vector<64x128xf32>
    %18 = arith.addf %17, %9 : vector<64x128xf32>
    %cst_9 = arith.constant 1.000000e-01 : f32
    %19 = vector.broadcast %cst_9 : f32 to vector<64x128xf32>
    %20 = arith.mulf %19, %18 : vector<64x128xf32>
    %21 = arith.maximumf %18, %20 : vector<64x128xf32>
    %c0_10 = arith.constant 0 : index
    %c0_11 = arith.constant 0 : index
    %22 = vector.load %arg4[%c0_10, %c0_11] : memref<128x128xf32, #tpu.memory_space<vmem>>, vector<128x128xf32>
    %c0_12 = arith.constant 0 : index
    %c0_13 = arith.constant 0 : index
    %23 = vector.load %arg5[%c0_12, %c0_13] : memref<1x128xf32, #tpu.memory_space<vmem>>, vector<1x128xf32>
    %cst_14 = arith.constant dense<0.000000e+00> : vector<64x128xf32>
    %24 = tpu.matmul %21, %22, %cst_14 {dimension_numbers = #tpu.dot_dimension_numbers<[1], [0], [0], [1], [0, 0, 1, 1], [], []>} : vector<64x128xf32>, vector<128x128xf32>, vector<64x128xf32> -> vector<64x128xf32>
    %25 = arith.truncf %24 : vector<64x128xf32> to vector<64x128xbf16>
    %cst_15 = arith.constant dense<0.000000e+00> : vector<64x128xf32>
    %26 = tpu.matmul %1, %25, %cst_15 {dimension_numbers = #tpu.dot_dimension_numbers<[1], [0], [0], [1], [0, 0, 1, 1], [], []>} : vector<64x64xbf16>, vector<64x128xbf16>, vector<64x128xf32> -> vector<64x128xf32>
    %27 = vector.broadcast %23 : vector<1x128xf32> to vector<64x128xf32>
    %28 = arith.addf %26, %27 : vector<64x128xf32>
    %cst_16 = arith.constant 1.000000e-01 : f32
    %29 = vector.broadcast %cst_16 : f32 to vector<64x128xf32>
    %30 = arith.mulf %29, %28 : vector<64x128xf32>
    %31 = arith.maximumf %28, %30 : vector<64x128xf32>
    %32 = arith.addf %31, %21 : vector<64x128xf32>
    %cst_17 = arith.constant 1.000000e-01 : f32
    %33 = vector.broadcast %cst_17 : f32 to vector<64x128xf32>
    %34 = arith.mulf %33, %32 : vector<64x128xf32>
    %35 = arith.maximumf %32, %34 : vector<64x128xf32>
    %36 = arith.mulf %35, %35 : vector<64x128xf32>
    %cst_18 = arith.constant dense<0.000000e+00> : vector<64xf32>
    %37 = vector.multi_reduction <add>, %36, %cst_18 [1] : vector<64x128xf32> to vector<64xf32>
    %38 = vector.shape_cast %37 : vector<64xf32> to vector<64x1xf32>
    %cst_19 = arith.constant 1.000000e-24 : f32
    %39 = vector.broadcast %cst_19 : f32 to vector<64x1xf32>
    %40 = arith.maximumf %38, %39 : vector<64x1xf32>
    %41 = math.rsqrt %40 : vector<64x1xf32>
    %42 = vector.broadcast %41 : vector<64x1xf32> to vector<64x128xf32>
    %43 = arith.mulf %35, %42 : vector<64x128xf32>
    %c0_20 = arith.constant 0 : index
    %c0_21 = arith.constant 0 : index
    %44 = vector.load %arg6[%c0_20, %c0_21] : memref<64x128xf32, #tpu.memory_space<vmem>>, vector<64x128xf32>
    tpu.vector_store %arg6[%c0_20, %c0_21], %43 {strides = array<i32>} : memref<64x128xf32, #tpu.memory_space<vmem>>, vector<64x128xf32>,
    return
  }
}

</mosaic_0001>

<bundles_post_ra>
// kernel: tpu_custom_call.1
= control target key start
LH: loop header
LB: loop body
LE: loop exit
PB: predicated region body
PF: predicated region fallthrough
CT: control target
= control target key end

     0   :  { %11 = vsyncpa [#allocation3], 0  ;;  %s1269_s0 = inlined_call_operand.hbm [shape: f32[64,128], index: 0, kind: input, shape index: {}]   ;;  %s1270_s1 = inlined_call_operand.hbm [shape: bf16[64,64], index: 1, kind: input, shape index: {}]   ;;  %s1271_s2 = inlined_call_operand.hbm [shape: f32[128,256], index: 2, kind: input, shape index: {}]   ;;  %s1272_s3 = inlined_call_operand.vmem [shape: f32[2,128], index: 3, kind: input, shape index: {}]   ;;  %s1273_s4 = inlined_call_operand.hbm [shape: f32[128,128], index: 4, kind: input, shape index: {}]   ;;  %s1274_s5 = inlined_call_operand.vmem [shape: f32[1,128], index: 5, kind: input, shape index: {}]   ;;  %s1275_s6 = inlined_call_operand.hbm [shape: f32[64,128], index: 6, kind: output, shape index: {}]  }
   0x1   :  { %12 = vsyncpa [#allocation6], 0 }
   0x2   :  { %13 = vsyncpa [#allocation9], 0 }
   0x3   :  { %14 = vsyncpa [#allocation4], 0  ;;  %s1063_s21 = smov [#allocation5]   ;;  %s945_s25 = scalar_lea.hbm %s1270_s1, 512 }
   0x4   :  { %s32_s22 = sshll.u32 %s1063_s21, 4  ;;  %p946_p0 = scmp.ne.s32.totalorder %s1270_s1, %s945_s25  ;;  %s33_s22 = int_to_ptr.vmem [resolvable:$true] %s32_s22 }
   0x5   :  { %p949_p1 = scmp.lt.u32.totalorder %s945_s25, %s1270_s1 }
   0x7   :  { %p951_p2 = pnand %p949_p1, %p946_p0 }
   0x9   :  { %954 = shalt.err (!%p951_p2)
}
   0xa   :  { %s955_s30 = scalar_lea.vmem %s33_s22, 512  ;;  %p960_p4 = scmp.lt.s32.totalorder %s33_s22, %s33_s22 }
   0xb   :  { %p956_p3 = scmp.ne.s32.totalorder %s33_s22, %s955_s30  ;;  %p961_p5 = scmp.lt.s32.totalorder %s955_s30, %s955_s30 }
   0xd   :  { %p962_p6 = por %p961_p5, %p960_p4 }
   0xf   :  { %p963_p7 = pnand %p962_p6, %p956_p3 }
  0x11   :  { %966 = shalt.err (!%p963_p7)
}
  0x12   :  { %s1064_s7 = smov 64   ;;  %s1065_s8 = smov 4  }
  0x13   :  { %38 = dma.hbm_to_vmem [thread:$0]  %s1270_s1, 512, %s33_s22, [#allocation6], %s1064_s7, %s1064_s7, %s1065_s8  }
  0x14   :  { %s1066_s11 = smov [#allocation2]   ;;  %s967_s15 = scalar_lea.hbm %s1269_s0, 1024 }
  0x15   :  { %s20_s12 = sshll.u32 %s1066_s11, 4  ;;  %p968_p8 = scmp.ne.s32.totalorder %s1269_s0, %s967_s15  ;;  %s21_s12 = int_to_ptr.vmem [resolvable:$true] %s20_s12 }
  0x16   :  { %p971_p9 = scmp.lt.u32.totalorder %s967_s15, %s1269_s0 }
  0x18   :  { %p973_p10 = pnand %p971_p9, %p968_p8 }
  0x1a   :  { %976 = shalt.err (!%p973_p10)
}
  0x1b   :  { %s977_s20 = scalar_lea.vmem %s21_s12, 1024  ;;  %p982_p12 = scmp.lt.s32.totalorder %s21_s12, %s21_s12 }
  0x1c   :  { %p978_p11 = scmp.ne.s32.totalorder %s21_s12, %s977_s20  ;;  %p983_p13 = scmp.lt.s32.totalorder %s977_s20, %s977_s20 }
  0x1e   :  { %p984_p0 = por %p983_p13, %p982_p12 }
  0x20   :  { %p985_p1 = pnand %p984_p0, %p978_p11 }
  0x22   :  { %988 = shalt.err (!%p985_p1)
}
  0x23   :  { %s1067_s1 = smov 128   ;;  %s1068_s21 = smov 8  }
  0x24   :  { %26 = dma.hbm_to_vmem [thread:$0]  %s1269_s0, 1024, %s21_s12, [#allocation3], %s1067_s1, %s1067_s1, %s1068_s21  }
  0x25   :  { %s1069_s24 = smov [#allocation7]   ;;  %s989_s28 = scalar_lea.hbm %s1271_s2, 4096 }
  0x26   :  { %s44_s25 = sshll.u32 %s1069_s24, 4  ;;  %p990_p2 = scmp.ne.s32.totalorder %s1271_s2, %s989_s28  ;;  %s45_s25 = int_to_ptr.vmem [resolvable:$true] %s44_s25 }
  0x27   :  { %p993_p3 = scmp.lt.u32.totalorder %s989_s28, %s1271_s2 }
  0x29   :  { %p995_p4 = pnand %p993_p3, %p990_p2 }
  0x2b   :  { %998 = shalt.err (!%p995_p4)
}
  0x2c   :  { %s999_s9 = scalar_lea.vmem %s45_s25, 4096  ;;  %p1004_p6 = scmp.lt.s32.totalorder %s45_s25, %s45_s25 }
  0x2d   :  { %p1000_p5 = scmp.ne.s32.totalorder %s45_s25, %s999_s9  ;;  %p1005_p7 = scmp.lt.s32.totalorder %s999_s9, %s999_s9 }
  0x2f   :  { %p1006_p8 = por %p1005_p7, %p1004_p6 }
  0x31   :  { %p1007_p9 = pnand %p1006_p8, %p1000_p5 }
  0x33   :  { %1010 = shalt.err (!%p1007_p9)
}
  0x34   :  { %s1070_s0 = smov 256   ;;  %s1071_s10 = smov 16  }
  0x35   :  { %50 = dma.hbm_to_vmem [thread:$0]  %s1271_s2, 4096, %s45_s25, [#allocation6], %s1070_s0, %s1070_s0, %s1071_s10  }
  0x36   :  { %s1072_s13 = smov [#allocation8]   ;;  %s1011_s17 = scalar_lea.hbm %s1273_s4, 2048 }
  0x37   :  { %s58_s14 = sshll.u32 %s1072_s13, 4  ;;  %p1012_p10 = scmp.ne.s32.totalorder %s1273_s4, %s1011_s17  ;;  %s59_s14 = int_to_ptr.vmem [resolvable:$true] %s58_s14 }
  0x38   :  { %p1015_p11 = scmp.lt.u32.totalorder %s1011_s17, %s1273_s4 }
  0x3a   :  { %p1017_p12 = pnand %p1015_p11, %p1012_p10 }
  0x3c   :  { %1020 = shalt.err (!%p1017_p12)
}
  0x3d   :  { %s1021_s23 = scalar_lea.vmem %s59_s14, 2048  ;;  %p1026_p0 = scmp.lt.s32.totalorder %s59_s14, %s59_s14 }
  0x3e   :  { %p1022_p13 = scmp.ne.s32.totalorder %s59_s14, %s1021_s23  ;;  %p1027_p1 = scmp.lt.s32.totalorder %s1021_s23, %s1021_s23 }
  0x40   :  { %p1028_p2 = por %p1027_p1, %p1026_p0 }
  0x42   :  { %p1029_p3 = pnand %p1028_p2, %p1022_p13 }
  0x44   :  { %1032 = shalt.err (!%p1029_p3)
}
  0x45   :  { %64 = dma.hbm_to_vmem [thread:$0]  %s1273_s4, 2048, %s59_s14, [#allocation9], %s1067_s1, %s1067_s1, %s1068_s21  }
  0x46   :  { %1055 = dma.done.wait [#allocation3], 1024  }
  0x47   :  { %1056 = vsyncadd [#allocation3], 4294966272 }
  0x48   :  { %1057 = dma.done.wait [#allocation6], 4608  }
  0x49   :  { %1058 = vsyncadd [#allocation6], 4294962688 }
  0x4a   :  { %1059 = dma.done.wait [#allocation9], 2048  }
  0x4b   :  { %1060 = vsyncadd [#allocation9], 4294965248  ;;  %v1073_v0 = vmov 0.0   ;;  %v97_v1 = vld [vmem:[#allocation7 + $0x8] sm:$0xff]  ;;  %v99_v2 = vld [vmem:[#allocation7 + $0x18] sm:$0xff]  ;;  %vm282_vm0 = vcmask 523264  }
  0x4c   :  { %193 = vmatprep.mubr.f32.mxu0 %v1073_v0  ;;  %v96_v3 = vld [vmem:[#allocation7] sm:$0xff]  ;;  %v841_v4 = vpack.c.bf16 %v99_v2, %v97_v1  ;;  %v98_v5 = vld [vmem:[#allocation7 + $0x10] sm:$0xff]  ;;  %v101_v6 = vld [vmem:[#allocation7 + $0x28] sm:$0xff] }
  0x4d   :  { %v103_v7 = vld [vmem:[#allocation7 + $0x38] sm:$0xff]  ;;  %v843_v8 = vpack.c.bf16 %v98_v5, %v96_v3  ;;  %v100_v10 = vld [vmem:[#allocation7 + $0x20] sm:$0xff]  ;;  %v102_v11 = vld [vmem:[#allocation7 + $0x30] sm:$0xff] }
  0x4e   :  { %v845_v9 = vpack.c.bf16 %v103_v7, %v101_v6  ;;  %v105_v12 = vld [vmem:[#allocation7 + $0x48] sm:$0xff]  ;;  %842 = vmatprep.subr.bf16.mxu0 %v841_v4  ;;  %v107_v13 = vld [vmem:[#allocation7 + $0x58] sm:$0xff]  ;;  %v847_v14 = vpack.c.bf16 %v102_v11, %v100_v10  ;;  %v104_v16 = vld [vmem:[#allocation7 + $0x40] sm:$0xff] }
  0x4f   :  { %844 = vmatpush1.bf16.msra.mxu0 %v843_v8  ;;  %v849_v15 = vpack.c.bf16 %v107_v13, %v105_v12  ;;  %v106_v17 = vld [vmem:[#allocation7 + $0x50] sm:$0xff]  ;;  %v109_v18 = vld [vmem:[#allocation7 + $0x68] sm:$0xff]  ;;  %v111_v19 = vld [vmem:[#allocation7 + $0x78] sm:$0xff] }
  0x50   :  { %846 = vmatprep.subr.bf16.mxu0 %v845_v9  ;;  %v851_v20 = vpack.c.bf16 %v106_v17, %v104_v16  ;;  %v853_v21 = vpack.c.bf16 %v111_v19, %v109_v18  ;;  %v108_v22 = vld [vmem:[#allocation7 + $0x60] sm:$0xff]  ;;  %v110_v23 = vld [vmem:[#allocation7 + $0x70] sm:$0xff]  ;;  %v113_v24 = vld [vmem:[#allocation7 + $0x88] sm:$0xff] }
  0x51   :  { %v115_v25 = vld [vmem:[#allocation7 + $0x98] sm:$0xff]  ;;  %v855_v26 = vpack.c.bf16 %v110_v23, %v108_v22  ;;  %v112_v27 = vld [vmem:[#allocation7 + $0x80] sm:$0xff]  ;;  %v114_v28 = vld [vmem:[#allocation7 + $0x90] sm:$0xff] }
  0x52   :  { %v117_v29 = vld [vmem:[#allocation7 + $0xa8] sm:$0xff]  ;;  %v857_v30 = vpack.c.bf16 %v115_v25, %v113_v24  ;;  %v119_v31 = vld [vmem:[#allocation7 + $0xb8] sm:$0xff]  ;;  %v859_v32 = vpack.c.bf16 %v114_v28, %v112_v27  ;;  %v116_v34 = vld [vmem:[#allocation7 + $0xa0] sm:$0xff] }
  0x53   :  { %848 = vmatpush1.bf16.msra.mxu0 %v847_v14  ;;  %v861_v33 = vpack.c.bf16 %v119_v31, %v117_v29  ;;  %v118_v35 = vld [vmem:[#allocation7 + $0xb0] sm:$0xff]  ;;  %v121_v36 = vld [vmem:[#allocation7 + $0xc8] sm:$0xff]  ;;  %v123_v37 = vld [vmem:[#allocation7 + $0xd8] sm:$0xff] }
  0x54   :  { %850 = vmatprep.subr.bf16.mxu0 %v849_v15  ;;  %v863_v38 = vpack.c.bf16 %v118_v35, %v116_v34  ;;  %v865_v39 = vpack.c.bf16 %v123_v37, %v121_v36  ;;  %v120_v40 = vld [vmem:[#allocation7 + $0xc0] sm:$0xff]  ;;  %v122_v41 = vld [vmem:[#allocation7 + $0xd0] sm:$0xff]  ;;  %v125_v42 = vld [vmem:[#allocation7 + $0xe8] sm:$0xff] }
  0x55   :  { %v127_v43 = vld [vmem:[#allocation7 + $0xf8] sm:$0xff]  ;;  %v867_v44 = vpack.c.bf16 %v122_v41, %v120_v40  ;;  %v124_v46 = vld [vmem:[#allocation7 + $0xe0] sm:$0xff]  ;;  %v126_v47 = vld [vmem:[#allocation7 + $0xf0] sm:$0xff]  ;;  %v242_v41 = vlaneseq }
  0x56   :  { %v869_v45 = vpack.c.bf16 %v127_v43, %v125_v42  ;;  %v871_v48 = vpack.c.bf16 %v126_v47, %v124_v46  ;;  %v80_v49 = vld [vmem:[#allocation2] sm:$0xff]  ;;  %v81_v50 = vld [vmem:[#allocation2 + $0x8] sm:$0xff]  ;;  %v82_v51 = vld [vmem:[#allocation2 + $0x10] sm:$0xff] }
  0x57   :  { %852 = vmatpush1.bf16.msra.mxu0 %v851_v20  ;;  %v83_v52 = vld [vmem:[#allocation2 + $0x18] sm:$0xff]  ;;  %v84_v53 = vld [vmem:[#allocation2 + $0x20] sm:$0xff]  ;;  %v85_v54 = vld [vmem:[#allocation2 + $0x28] sm:$0xff]  ;;  %v243_v42 = vshrl.u32 %v242_v41, 7 }
  0x58   :  { %854 = vmatprep.subr.bf16.mxu0 %v853_v21  ;;  %v86_v55 = vld [vmem:[#allocation2 + $0x30] sm:$0xff]  ;;  %v87_v56 = vld [vmem:[#allocation2 + $0x38] sm:$0xff]  ;;  %v925_v57 = vld [vmem:[#allocation5] sm:$0xff]  }
  0x59   :  { %773 = vmatprep.mubr.msk.bf16.mxu1 %vm282_vm0, %v925_v57  ;;  %v400_v11 = vld [vmem:[#allocation8] sm:$0xff]  ;;  %v401_v12 = vld [vmem:[#allocation8 + $0x8] sm:$0xff]  ;;  %v402_v17 = vld [vmem:[#allocation8 + $0x10] sm:$0xff]  ;;  %v260_v43 = vsub.s32 0, %v243_v42  ;;  %v244_v46 = vsub.s32 1, %v243_v42 }
  0x5a   :  { %v873_v16 = vpack.c.bf16 %v401_v12, %v400_v11  ;;  %v403_v18 = vld [vmem:[#allocation8 + $0x18] sm:$0xff]  ;;  %v1190_v19 = vld [vmem:[#allocation5 + $0x8] sm:$0xff]   ;;  %v1192_v20 = vld [vmem:[#allocation5 + $0x10] sm:$0xff]  }
  0x5b   :  { %856 = vmatpush1.bf16.msra.mxu0 %v855_v26  ;;  %v877_v21 = vpack.c.bf16 %v403_v18, %v402_v17  ;;  %v404_v22 = vld [vmem:[#allocation8 + $0x20] sm:$0xff]  ;;  %v405_v23 = vld [vmem:[#allocation8 + $0x28] sm:$0xff]  ;;  %v406_v25 = vld [vmem:[#allocation8 + $0x30] sm:$0xff] }
  0x5c   :  { %858 = vmatprep.subr.bf16.mxu0 %v857_v30  ;;  %v881_v24 = vpack.c.bf16 %v405_v23, %v404_v22  ;;  %v407_v26 = vld [vmem:[#allocation8 + $0x38] sm:$0xff]  ;;  %v408_v29 = vld [vmem:[#allocation8 + $0x40] sm:$0xff]  ;;  %v409_v30 = vld [vmem:[#allocation8 + $0x48] sm:$0xff] }
  0x5d   :  { %v1198_v27 = vld [vmem:[#allocation5 + $0x18] sm:$0xff]   ;;  %v885_v28 = vpack.c.bf16 %v407_v26, %v406_v25  ;;  %v889_v31 = vpack.c.bf16 %v409_v30, %v408_v29  ;;  %v412_v35 = vld [vmem:[#allocation8 + $0x60] sm:$0xff]  ;;  %v413_v36 = vld [vmem:[#allocation8 + $0x68] sm:$0xff] }
  0x5e   :  { %v897_v37 = vpack.c.bf16 %v413_v36, %v412_v35 }
  0x5f   :  { %860 = vmatpush1.bf16.msra.mxu0 %v859_v32  ;;  %v410_v32 = vld [vmem:[#allocation8 + $0x50] sm:$0xff] }
  0x60   :  { %862 = vmatprep.subr.bf16.mxu0 %v861_v33  ;;  %v411_v33 = vld [vmem:[#allocation8 + $0x58] sm:$0xff] }
  0x61   :  { %v893_v34 = vpack.c.bf16 %v411_v33, %v410_v32 }
  0x63   :  { %864 = vmatpush1.bf16.msra.mxu0 %v863_v38  ;;  %v414_v38 = vld [vmem:[#allocation8 + $0x70] sm:$0xff] }
  0x64   :  { %866 = vmatprep.subr.bf16.mxu0 %v865_v39  ;;  %v415_v39 = vld [vmem:[#allocation8 + $0x78] sm:$0xff] }
  0x65   :  { %v901_v40 = vpack.c.bf16 %v415_v39, %v414_v38 }
  0x67   :  { %868 = vmatpush1.bf16.msra.mxu0 %v867_v44  ;;  %v128_v44 = vld [vmem:[%s1272_s3] sm:$0x3] }
  0x68   :  { %870 = vmatprep.subr.bf16.mxu0 %v869_v45  ;;  %v261_v45 = vrot.slane %v128_v44, %v260_v43 }
  0x6b   :  { %872 = vmatpush1.bf16.msra.mxu0 %v871_v48 }
  0x6e   :  { %194 = vmatmul.mubr.f32.vlgmr.msra.gmra.mrb[0].mxu0 %v80_v49 }
  0x6f   :  { %199 = vmatprep.mubr.f32.mxu0 %v1073_v0 }
  0x72   :  { %200 = vmatmul.mubr.f32.gmra.mrb[2].mxu0 %v81_v50  ;;  %v245_v50 = vrot.slane %v128_v44, %v244_v46 }
  0x73   :  { %205 = vmatprep.mubr.f32.mxu0 %v1073_v0 }
  0x76   :  { %206 = vmatmul.mubr.f32.gmra.mrb[4].mxu0 %v82_v51 }
  0x77   :  { %211 = vmatprep.mubr.f32.mxu0 %v1073_v0 }
  0x7a   :  { %212 = vmatmul.mubr.f32.gmra.mrb[6].mxu0 %v83_v52 }
  0x7b   :  { %217 = vmatprep.mubr.f32.mxu0 %v1073_v0 }
  0x7e   :  { %218 = vmatmul.mubr.f32.gmra.mrb[8].mxu0 %v84_v53 }
  0x7f   :  { %223 = vmatprep.mubr.f32.mxu0 %v1073_v0 }
  0x82   :  { %224 = vmatmul.mubr.f32.gmra.mrb[10].mxu0 %v85_v54 }
  0x83   :  { %229 = vmatprep.mubr.f32.mxu0 %v1073_v0 }
  0x86   :  { %230 = vmatmul.mubr.f32.gmra.mrb[12].mxu0 %v86_v55 }
  0x87   :  { %235 = vmatprep.mubr.f32.mxu0 %v1073_v0 }
  0x8a   :  { %236 = vmatmul.mubr.f32.gmra.mrb[14].mxu0 %v87_v56 }
  0x8b   :  { %833 = vmatprep.mubr.msk.bf16.mxu0 %vm282_vm0, %v925_v57 }
 0x141   :  { %v195_v58 = vpop.f32.mrb[0].mxu0 }
 0x142   :  { %v1174_v59 = vpop.f32.mrb[1].mxu0 }
 0x145   :  { %v201_v60 = vpop.f32.mrb[2].mxu0 }
 0x146   :  { %v254_v61 = vpack.c.bf16 %v201_v60, %v195_v58  ;;  %v1176_v62 = vpop.f32.mrb[3].mxu0 }
 0x148   :  { %765 = vmatprep.subr.bf16.mxu1 %v254_v61 }
 0x149   :  { %v207_v63 = vpop.f32.mrb[4].mxu0  ;;  %766 = vmatpush3.bf16.msra.mxu1 %v254_v61 }
 0x14a   :  { %v1178_v1 = vpop.f32.mrb[5].mxu0 }
 0x14b   :  { %v248_v58 = vadd.f32 %v245_v50, %v1178_v1 }
 0x14d   :  { %v213_v0 = vpop.f32.mrb[6].mxu0 }
 0x14e   :  { %v255_v2 = vpack.c.bf16 %v213_v0, %v207_v63  ;;  %v1180_v3 = vpop.f32.mrb[7].mxu0  ;;  %v246_v63 = vadd.f32 %v245_v50, %v1174_v59 }
 0x150   :  { %767 = vmatprep.subr.bf16.mxu1 %v255_v2 }
 0x151   :  { %v219_v4 = vpop.f32.mrb[8].mxu0  ;;  %768 = vmatpush3.bf16.msra.mxu1 %v255_v2 }
 0x152   :  { %v1182_v5 = vpop.f32.mrb[9].mxu0 }
 0x155   :  { %v225_v6 = vpop.f32.mrb[10].mxu0 }
 0x156   :  { %v256_v7 = vpack.c.bf16 %v225_v6, %v219_v4  ;;  %v1184_v8 = vpop.f32.mrb[11].mxu0  ;;  %v249_v4 = vadd.f32 %v245_v50, %v1180_v3 }
 0x157   :  { %v251_v41 = vadd.f32 %v245_v50, %v1184_v8 }
 0x158   :  { %769 = vmatprep.subr.bf16.mxu1 %v256_v7 }
 0x159   :  { %v231_v9 = vpop.f32.mrb[12].mxu0  ;;  %770 = vmatpush3.bf16.msra.mxu1 %v256_v7 }
 0x15a   :  { %v1186_v10 = vpop.f32.mrb[13].mxu0 }
 0x15b   :  { %v252_v30 = vadd.f32 %v245_v50, %v1186_v10 }
 0x15d   :  { %v237_v13 = vpop.f32.mrb[14].mxu0 }
 0x15e   :  { %v257_v14 = vpack.c.bf16 %v237_v13, %v231_v9  ;;  %v1188_v15 = vpop.f32.mrb[15].mxu0  ;;  %v247_v9 = vadd.f32 %v245_v50, %v1176_v62  ;;  %v250_v62 = vadd.f32 %v245_v50, %v1182_v5 }
 0x160   :  { %771 = vmatprep.subr.bf16.mxu1 %v257_v14 }
 0x161   :  { %772 = vmatpush3.bf16.msra.mxu1 %v257_v14 }
 0x162   :  { %874 = vmatprep.subr.bf16.mxu1 %v873_v16 }
 0x164   :  { %774 = vmatmul.mubr.msk.bf16.vlgmr.msra.gmra.mrb[0].mxu1 %vm282_vm0, %v1190_v19 }
 0x165   :  { %777 = vmatprep.mubr.msk.bf16.mxu1 %vm282_vm0, %v1192_v20  ;;  %876 = vmatpush3.bf16.msra.mxu1 %v873_v16 }
 0x166   :  { %878 = vmatprep.subr.bf16.mxu1 %v877_v21 }
 0x169   :  { %880 = vmatpush3.bf16.msra.mxu1 %v877_v21 }
 0x16a   :  { %882 = vmatprep.subr.bf16.mxu1 %v881_v24 }
 0x16c   :  { %778 = vmatmul.mubr.msk.bf16.gmra.mrb[4].mxu1 %vm282_vm0, %v1198_v27 }
 0x16d   :  { %884 = vmatpush3.bf16.msra.mxu1 %v881_v24 }
 0x16e   :  { %886 = vmatprep.subr.bf16.mxu1 %v885_v28 }
 0x171   :  { %888 = vmatpush3.bf16.msra.mxu1 %v885_v28 }
 0x172   :  { %890 = vmatprep.subr.bf16.mxu1 %v889_v31 }
 0x175   :  { %892 = vmatpush3.bf16.msra.mxu1 %v889_v31 }
 0x176   :  { %894 = vmatprep.subr.bf16.mxu1 %v893_v34 }
 0x179   :  { %896 = vmatpush3.bf16.msra.mxu1 %v893_v34 }
 0x17a   :  { %898 = vmatprep.subr.bf16.mxu1 %v897_v37 }
 0x17d   :  { %900 = vmatpush3.bf16.msra.mxu1 %v897_v37  ;;  %v253_v37 = vadd.f32 %v245_v50, %v1188_v15 }
 0x17e   :  { %902 = vmatprep.subr.bf16.mxu1 %v901_v40 }
 0x181   :  { %904 = vmatpush3.bf16.msra.mxu1 %v901_v40 }
 0x237   :  { %v775_v47 = vpop.f32.mrb[0].mxu1 }
 0x238   :  { %v338_v48 = vadd.f32 %v775_v47, %v261_v45  ;;  %v329_v49 = vpop.f32.mrb[1].mxu1 }
 0x239   :  { %v330_v51 = vadd.f32 %v329_v49, %v261_v45  ;;  %v776_v52 = vpop.f32.mrb[2].mxu1 }
 0x23a   :  { %v362_v53 = vmul.f32 0.1, %v338_v48  ;;  %v341_v54 = vadd.f32 %v776_v52, %v261_v45  ;;  %v332_v55 = vpop.f32.mrb[3].mxu1 }
 0x23b   :  { %v360_v56 = vmul.f32 0.1, %v330_v51  ;;  %v333_v57 = vadd.f32 %v332_v55, %v261_v45 }
 0x23c   :  { %v370_v60 = vmax.f32 %v338_v48, %v362_v53  ;;  %v363_v61 = vmul.f32 0.1, %v341_v54 }
 0x23d   :  { %v368_v0 = vmax.f32 %v330_v51, %v360_v56  ;;  %v361_v2 = vmul.f32 0.1, %v333_v57 }
 0x23e   :  { %v378_v6 = vadd.f32 %v370_v60, %v248_v58  ;;  %v371_v7 = vmax.f32 %v341_v54, %v363_v61 }
 0x23f   :  { %v376_v11 = vadd.f32 %v368_v0, %v246_v63  ;;  %v369_v12 = vmax.f32 %v333_v57, %v361_v2  ;;  %v779_v13 = vpop.f32.mrb[4].mxu1  ;;  %v720_v0 = vld [vmem:[%s1274_s5] ss:$0 sm:$0xff]  ;;  %s1074_s5 = smov [#allocation10]  }
 0x240   :  { %v379_v14 = vadd.f32 %v371_v7, %v249_v4  ;;  %v354_v16 = vadd.f32 %v779_v13, %v261_v45  ;;  %v345_v17 = vpop.f32.mrb[5].mxu1  ;;  %v386_v25 = vmul.f32 0.1, %v378_v6  ;;  %s698_s27 = sshll.u32 %s1074_s5, 4  ;;  %s699_s27 = int_to_ptr.vmem [resolvable:$true] %s698_s27 }
 0x241   :  { %v377_v18 = vadd.f32 %v369_v12, %v247_v9  ;;  %v346_v1 = vadd.f32 %v345_v17, %v261_v45  ;;  %v780_v21 = vpop.f32.mrb[6].mxu1  ;;  %v384_v22 = vmul.f32 0.1, %v376_v11  ;;  %s1033_s28 = scalar_lea.vmem %s699_s27, 1024  ;;  %p1038_p5 = scmp.lt.s32.totalorder %s699_s27, %s699_s27 }
 0x242   :  { %v366_v23 = vmul.f32 0.1, %v354_v16  ;;  %v357_v59 = vadd.f32 %v780_v21, %v261_v45  ;;  %v348_v24 = vpop.f32.mrb[7].mxu1  ;;  %v387_v36 = vmul.f32 0.1, %v379_v14  ;;  %v1217_v40 = vmax.f32 %v378_v6, %v386_v25  ;;  %p1034_p4 = scmp.ne.s32.totalorder %s699_s27, %s1033_s28  ;;  %p1039_p6 = scmp.lt.s32.totalorder %s1033_s28, %s1033_s28 }
 0x243   :  { %v385_v26 = vmul.f32 0.1, %v377_v18  ;;  %v364_v3 = vmul.f32 0.1, %v346_v1  ;;  %v349_v28 = vadd.f32 %v348_v24, %v261_v45  ;;  %v1209_v29 = vmax.f32 %v376_v11, %v384_v22 }
 0x244   :  { %v374_v31 = vmax.f32 %v354_v16, %v366_v23  ;;  %v367_v32 = vmul.f32 0.1, %v357_v59  ;;  %v1222_v44 = vmax.f32 %v379_v14, %v387_v36  ;;  %p1040_p7 = por %p1039_p6, %p1038_p5 }
 0x245   :  { %v1213_v33 = vmax.f32 %v377_v18, %v385_v26  ;;  %v372_v34 = vmax.f32 %v346_v1, %v364_v3  ;;  %v365_v35 = vmul.f32 0.1, %v349_v28  ;;  %813 = vmatprep.mubr.f32.mxu1 %v1209_v29 }
 0x246   :  { %v382_v38 = vadd.f32 %v374_v31, %v252_v30  ;;  %v375_v39 = vmax.f32 %v357_v59, %v367_v32  ;;  %p1041_p8 = pnand %p1040_p7, %p1034_p4 }
 0x247   :  { %v380_v5 = vadd.f32 %v372_v34, %v250_v62  ;;  %v373_v42 = vmax.f32 %v349_v28, %v365_v35  ;;  %814 = vmatmul.mubr.f32.vlgmr.msra.gmra.mrb[8].mxu1 %v1213_v33 }
 0x248   :  { %v383_v10 = vadd.f32 %v375_v39, %v253_v37  ;;  %816 = vmatprep.mubr.f32.mxu1 %v1217_v40  ;;  %v390_v46 = vmul.f32 0.1, %v382_v38 }
 0x249   :  { %v381_v43 = vadd.f32 %v373_v42, %v251_v41  ;;  %v388_v45 = vmul.f32 0.1, %v380_v5 }
 0x24a   :  { %v391_v48 = vmul.f32 0.1, %v383_v10  ;;  %v1230_v49 = vmax.f32 %v382_v38, %v390_v46 }
 0x24b   :  { %817 = vmatmul.mubr.f32.gmra.mrb[10].mxu1 %v1222_v44  ;;  %v1225_v15 = vmax.f32 %v380_v5, %v388_v45  ;;  %v389_v47 = vmul.f32 0.1, %v381_v43 }
 0x24c   :  { %v1234_v50 = vmax.f32 %v383_v10, %v391_v48 }
 0x24d   :  { %819 = vmatprep.mubr.f32.mxu1 %v1225_v15  ;;  %v1228_v8 = vmax.f32 %v381_v43, %v389_v47 }
 0x24f   :  { %820 = vmatmul.mubr.f32.gmra.mrb[12].mxu1 %v1228_v8 }
 0x250   :  { %822 = vmatprep.mubr.f32.mxu1 %v1230_v49 }
 0x253   :  { %823 = vmatmul.mubr.f32.gmra.mrb[14].mxu1 %v1234_v50 }
 0x254   :  { %837 = vmatprep.mubr.msk.bf16.mxu1 %vm282_vm0, %v1192_v20 }
 0x31a   :  { %v815_v51 = vpop.f32.mrb[8].mxu1 }
 0x31b   :  { %v483_v52 = vpop.f32.mrb[9].mxu1 }
 0x31c   :  { %v522_v53 = vpack.c.bf16 %v815_v51, %v483_v52 }
 0x31e   :  { %v818_v54 = vpop.f32.mrb[10].mxu1  ;;  %825 = vmatprep.subr.bf16.mxu0 %v522_v53  ;;  %905 = vmatprep.subr.bf16.mxu1 %v522_v53 }
 0x31f   :  { %v493_v55 = vpop.f32.mrb[11].mxu1  ;;  %826 = vmatpush3.bf16.msra.mxu0 %v522_v53  ;;  %909 = vmatpush3.bf16.msra.mxu1 %v522_v53 }
 0x320   :  { %v523_v56 = vpack.c.bf16 %v818_v54, %v493_v55 }
 0x322   :  { %v821_v57 = vpop.f32.mrb[12].mxu1  ;;  %827 = vmatprep.subr.bf16.mxu0 %v523_v56  ;;  %906 = vmatprep.subr.bf16.mxu1 %v523_v56 }
 0x323   :  { %v503_v58 = vpop.f32.mrb[13].mxu1  ;;  %828 = vmatpush3.bf16.msra.mxu0 %v523_v56  ;;  %910 = vmatpush3.bf16.msra.mxu1 %v523_v56 }
 0x324   :  { %v524_v60 = vpack.c.bf16 %v821_v57, %v503_v58 }
 0x326   :  { %v824_v61 = vpop.f32.mrb[14].mxu1  ;;  %829 = vmatprep.subr.bf16.mxu0 %v524_v60  ;;  %907 = vmatprep.subr.bf16.mxu1 %v524_v60 }
 0x327   :  { %v513_v20 = vpop.f32.mrb[15].mxu1  ;;  %830 = vmatpush3.bf16.msra.mxu0 %v524_v60  ;;  %911 = vmatpush3.bf16.msra.mxu1 %v524_v60 }
 0x328   :  { %v525_v63 = vpack.c.bf16 %v824_v61, %v513_v20 }
 0x32a   :  { %831 = vmatprep.subr.bf16.mxu0 %v525_v63  ;;  %908 = vmatprep.subr.bf16.mxu1 %v525_v63 }
 0x32b   :  { %832 = vmatpush3.bf16.msra.mxu0 %v525_v63  ;;  %912 = vmatpush3.bf16.msra.mxu1 %v525_v63 }
 0x32e   :  { %834 = vmatmul.mubr.msk.bf16.vlgmr.msra.gmra.mrb[16].mxu0 %vm282_vm0, %v1190_v19  ;;  %838 = vmatmul.mubr.msk.bf16.vlgmr.msra.gmra.mrb[16].mxu1 %vm282_vm0, %v1198_v27 }
 0x401   :  { %v835_v2 = vpop.f32.mrb[16].mxu0  ;;  %v839_v4 = vpop.f32.mrb[16].mxu1 }
 0x402   :  { %v575_v6 = vadd.f32 %v835_v2, %v720_v0  ;;  %v591_v7 = vadd.f32 %v839_v4, %v720_v0  ;;  %v566_v9 = vpop.f32.mrb[17].mxu0  ;;  %v582_v11 = vpop.f32.mrb[17].mxu1 }
 0x403   :  { %v567_v12 = vadd.f32 %v720_v0, %v566_v9  ;;  %v583_v13 = vadd.f32 %v720_v0, %v582_v11  ;;  %v836_v14 = vpop.f32.mrb[18].mxu0  ;;  %v840_v16 = vpop.f32.mrb[18].mxu1 }
 0x404   :  { %v599_v17 = vmul.f32 0.1, %v575_v6  ;;  %v578_v18 = vadd.f32 %v836_v14, %v720_v0  ;;  %v594_v19 = vadd.f32 %v840_v16, %v720_v0  ;;  %v569_v1 = vpop.f32.mrb[19].mxu0  ;;  %v585_v21 = vpop.f32.mrb[19].mxu1  ;;  %v603_v25 = vmul.f32 0.1, %v591_v7 }
 0x405   :  { %v597_v27 = vmul.f32 0.1, %v567_v12  ;;  %v601_v22 = vmul.f32 0.1, %v583_v13  ;;  %v570_v23 = vadd.f32 %v720_v0, %v569_v1  ;;  %v586_v59 = vadd.f32 %v720_v0, %v585_v21 }
 0x406   :  { %v607_v24 = vmax.f32 %v575_v6, %v599_v17  ;;  %v600_v26 = vmul.f32 0.1, %v578_v18  ;;  %v604_v3 = vmul.f32 0.1, %v594_v19  ;;  %v611_v39 = vmax.f32 %v591_v7, %v603_v25 }
 0x407   :  { %v605_v28 = vmax.f32 %v567_v12, %v597_v27  ;;  %v609_v62 = vmax.f32 %v583_v13, %v601_v22  ;;  %v598_v30 = vmul.f32 0.1, %v570_v23  ;;  %v602_v31 = vmul.f32 0.1, %v586_v59 }
 0x408   :  { %v608_v32 = vmax.f32 %v578_v18, %v600_v26  ;;  %v615_v34 = vadd.f32 %v607_v24, %v1217_v40  ;;  %v612_v5 = vmax.f32 %v594_v19, %v604_v3 }
 0x409   :  { %v617_v35 = vadd.f32 %v609_v62, %v1225_v15  ;;  %v606_v36 = vmax.f32 %v570_v23, %v598_v30  ;;  %v610_v37 = vmax.f32 %v586_v59, %v602_v31  ;;  %v613_v38 = vadd.f32 %v605_v28, %v1209_v29 }
 0x40a   :  { %v616_v41 = vadd.f32 %v608_v32, %v1222_v44  ;;  %v623_v42 = vmul.f32 0.1, %v615_v34  ;;  %v620_v15 = vadd.f32 %v612_v5, %v1234_v50  ;;  %v619_v29 = vadd.f32 %v611_v39, %v1230_v49 }
 0x40b   :  { %v614_v10 = vadd.f32 %v606_v36, %v1213_v33  ;;  %v618_v43 = vadd.f32 %v610_v37, %v1228_v8  ;;  %v621_v45 = vmul.f32 0.1, %v613_v38  ;;  %v625_v46 = vmul.f32 0.1, %v617_v35 }
 0x40c   :  { %v631_v47 = vmax.f32 %v615_v34, %v623_v42  ;;  %v624_v48 = vmul.f32 0.1, %v616_v41  ;;  %v628_v8 = vmul.f32 0.1, %v620_v15  ;;  %v627_v60 = vmul.f32 0.1, %v619_v29 }
 0x40d   :  { %v629_v40 = vmax.f32 %v613_v38, %v621_v45  ;;  %v626_v53 = vmul.f32 0.1, %v618_v43  ;;  %v633_v44 = vmax.f32 %v617_v35, %v625_v46  ;;  %v622_v55 = vmul.f32 0.1, %v614_v10 }
 0x40e   :  { %v639_v51 = vmul.f32 %v631_v47, %v631_v47  ;;  %v632_v52 = vmax.f32 %v616_v41, %v624_v48  ;;  %v636_v50 = vmax.f32 %v620_v15, %v628_v8  ;;  %v635_v63 = vmax.f32 %v619_v29, %v627_v60 }
 0x40f   :  { %v637_v54 = vmul.f32 %v629_v40, %v629_v40  ;;  %v634_v56 = vmax.f32 %v618_v43, %v626_v53  ;;  %v641_v57 = vmul.f32 %v633_v44, %v633_v44  ;;  %v630_v58 = vmax.f32 %v614_v10, %v622_v55 }
 0x410   :  { %649 = vadd.xlane.f32.xlu1 %v639_v51  ;;  %v640_v33 = vmul.f32 %v632_v52, %v632_v52  ;;  %v644_v49 = vmul.f32 %v636_v50, %v636_v50  ;;  %v643_v0 = vmul.f32 %v635_v63, %v635_v63 }
 0x411   :  { %645 = vadd.xlane.f32.xlu0 %v637_v54  ;;  %v642_v61 = vmul.f32 %v634_v56, %v634_v56  ;;  %v638_v20 = vmul.f32 %v630_v58, %v630_v58 }
 0x414   :  { %651 = vadd.xlane.f32.xlu1 %v640_v33 }
 0x415   :  { %653 = vadd.xlane.f32.xlu0 %v641_v57 }
 0x418   :  { %655 = vadd.xlane.f32.xlu1 %v642_v61 }
 0x419   :  { %647 = vadd.xlane.f32.xlu0 %v638_v20 }
 0x41c   :  { %659 = vadd.xlane.f32.xlu1 %v644_v49 }
 0x41d   :  { %657 = vadd.xlane.f32.xlu0 %v643_v0 }
 0x49d   :  { %v650_v2 = vpop.xlane.xlu1 %649 }
 0x49e   :  { %v663_v4 = vmax.f32 %v650_v2, 1e-24  ;;  %v646_v6 = vpop.xlane.xlu0 %645 }
 0x49f   :  { %v661_v7 = vmax.f32 %v646_v6, 1e-24 }
 0x4a0   :  { %929 = vrsqrt.f32 %v663_v4 }
 0x4a1   :  { %931 = vrsqrt.f32 %v661_v7  ;;  %v652_v9 = vpop.xlane.xlu1 %651 }
 0x4a2   :  { %v664_v11 = vmax.f32 %v652_v9, 1e-24  ;;  %v654_v12 = vpop.xlane.xlu0 %653 }
 0x4a3   :  { %v665_v13 = vmax.f32 %v654_v12, 1e-24 }
 0x4a4   :  { %933 = vrsqrt.f32 %v664_v11 }
 0x4a5   :  { %935 = vrsqrt.f32 %v665_v13  ;;  %v656_v14 = vpop.xlane.xlu1 %655 }
 0x4a6   :  { %v666_v16 = vmax.f32 %v656_v14, 1e-24  ;;  %v648_v17 = vpop.xlane.xlu0 %647 }
 0x4a7   :  { %v662_v18 = vmax.f32 %v648_v17, 1e-24 }
 0x4a8   :  { %937 = vrsqrt.f32 %v666_v16 }
 0x4a9   :  { %939 = vrsqrt.f32 %v662_v18  ;;  %v660_v19 = vpop.xlane.xlu1 %659 }
 0x4aa   :  { %v930_v1 = vpop.eup %929  ;;  %v668_v21 = vmax.f32 %v660_v19, 1e-24  ;;  %v658_v27 = vpop.xlane.xlu0 %657 }
 0x4ab   :  { %v932_v22 = vpop.eup %931  ;;  %v679_v23 = vmul.f32 %v930_v1, %v631_v47  ;;  %v667_v59 = vmax.f32 %v658_v27, 1e-24 }
 0x4ac   :  { %v677_v24 = vmul.f32 %v932_v22, %v629_v40  ;;  %941 = vrsqrt.f32 %v668_v21 }
 0x4ad   :  { %687 = vst [vmem:[#allocation10 + $0x10] sm:$0xff] %v679_v23  ;;  %943 = vrsqrt.f32 %v667_v59 }
 0x4ae   :  { %v934_v25 = vpop.eup %933  ;;  %685 = vst [vmem:[#allocation10] sm:$0xff] %v677_v24 }
 0x4af   :  { %v936_v26 = vpop.eup %935  ;;  %v680_v3 = vmul.f32 %v934_v25, %v632_v52 }
 0x4b0   :  { %v681_v28 = vmul.f32 %v936_v26, %v633_v44 }
 0x4b1   :  { %688 = vst [vmem:[#allocation10 + $0x18] sm:$0xff] %v680_v3 }
 0x4b2   :  { %v938_v62 = vpop.eup %937  ;;  %689 = vst [vmem:[#allocation10 + $0x20] sm:$0xff] %v681_v28 }
 0x4b3   :  { %v940_v30 = vpop.eup %939  ;;  %v682_v31 = vmul.f32 %v938_v62, %v634_v56 }
 0x4b4   :  { %v678_v32 = vmul.f32 %v940_v30, %v630_v58 }
 0x4b5   :  { %690 = vst [vmem:[#allocation10 + $0x28] sm:$0xff] %v682_v31 }
 0x4b6   :  { %v942_v34 = vpop.eup %941  ;;  %686 = vst [vmem:[#allocation10 + $0x8] sm:$0xff] %v678_v32 }
 0x4b7   :  { %v944_v35 = vpop.eup %943  ;;  %v684_v36 = vmul.f32 %v942_v34, %v636_v50 }
 0x4b8   :  { %v683_v37 = vmul.f32 %v944_v35, %v635_v63 }
 0x4b9   :  { %692 = vst [vmem:[#allocation10 + $0x38] sm:$0xff] %v684_v36 }
 0x4ba   :  { %691 = vst [vmem:[#allocation10 + $0x30] sm:$0xff] %v683_v37 }
 0x4bb   :  { %1044 = shalt.err (!%p1041_p8)
}
 0x4bc   :  { %s1045_s7 = scalar_lea.hbm %s1275_s6, 1024 }
 0x4bd   :  { %p1046_p9 = scmp.ne.s32.totalorder %s1275_s6, %s1045_s7  ;;  %p1049_p10 = scmp.lt.u32.totalorder %s1045_s7, %s1275_s6 }
 0x4bf   :  { %p1051_p11 = pnand %p1049_p10, %p1046_p9 }
 0x4c1   :  { %1054 = shalt.err (!%p1051_p11)
}
 0x4c2   :  { %704 = dma.vmem_to_hbm [thread:$0]  %s699_s27, 1024, %s1275_s6, [#allocation4], %s1067_s1, %s1067_s1, %s1068_s21  }
 0x4c3   :  { %1061 = dma.done.wait [#allocation4], 1024  }
 0x4c4   :  { %1062 = vsyncadd [#allocation4], 4294966272 }
 0x4c5   :  { %708 = vsyncpa [#allocation3], 1 }
 0x4c6   :  { %709 = vsyncpa [#allocation6], 1 }
 0x4c7   :  { %710 = vsyncpa [#allocation9], 1 }
 0x4c8   :  { %711 = vsyncpa [#allocation4], 1 }

</bundles_post_ra>
